<compile_context>
chip_gen: v7x
topology: tpu7x:2x2x1
jax: 0.10.0
libtpu: 0.0.40
codegen_flags: <defaults>
</compile_context>

<pallas_src>
import math
import numpy as np
import jax
import jax.numpy as jnp
from jax.experimental import pallas as pl
from jax.experimental.pallas import tpu as pltpu

_LANE = 128
_SUBLANE = 8
_TM_MAX = 512                      # 256-multiple: feeds 256x256 MXUs on v6e/v7x
_TN_MAX = 512
_TK_MAX = {2: 1024, 4: 512}        # per operand itemsize (bf16 / f32)
_VMEM_LIMIT_BYTES = 32 * 1024 * 1024   # block working set is <= ~10 MiB; safe on
                                       # v5e/v6e (128 MiB) and v7x (64 MiB) VMEM


def _round_up(x, m):
    return ((x + m - 1) // m) * m


def _vmem_budget_bytes():
    """Budget for the live block working set, gated on the chip's VMEM size."""
    cap = 128 * 1024 * 1024
    try:
        cap = getattr(pltpu.get_tpu_info(), "vmem_capacity_bytes", cap)
    except Exception:
        pass
    # Leave headroom for double-buffering / compiler scratch; cap at 24 MiB.
    return min(cap // 3, 24 * 1024 * 1024)


def _pick_nk_tiles(out_features, in_features, itemsize, budget):
    """Pick (tn, tk). Prefer collapsing the K reduction entirely if it fits VMEM."""
    tn = min(_TN_MAX, _round_up(out_features, _LANE))
    kp_full = _round_up(in_features, _LANE)

    def footprint(tk):
        # 2x double-buffered x & w input tiles + 2x f32 output tile + bias tile.
        return (2 * (_TM_MAX + tn) * tk * itemsize
                + 2 * _TM_MAX * tn * 4
                + 2 * tn * 4)

    if footprint(kp_full) <= budget:
        return tn, kp_full                       # single-sweep K (no reduction loop)
    tk = min(_TK_MAX.get(itemsize, 1024), kp_full)
    while footprint(tk) > budget and tk > _LANE:
        tk = max(_LANE, (tk // 2 // _LANE) * _LANE)
    return tn, max(tk, _LANE)


# ----------------------------- kernels ------------------------------------- #

def _masked_linear_kernel_single(x_ref, w_ref, b_ref, o_ref):
    """Single-sweep kernel (K collapsed): o = x @ w + b in one MXU pass."""
    acc = jnp.dot(x_ref[...], w_ref[...], preferred_element_type=jnp.float32)
    o_ref[...] = acc + b_ref[...]


def _masked_linear_kernel_ksplit(x_ref, w_ref, b_ref, o_ref):
    """K-split kernel: reduction axis last; the f32 output block (block index
    constant across k, so it stays VMEM-resident) is the accumulator."""
    @pl.when(pl.program_id(2) == 0)
    def _():
        o_ref[...] = jnp.broadcast_to(b_ref[...], o_ref.shape)

    o_ref[...] += jnp.dot(x_ref[...], w_ref[...],
                          preferred_element_type=jnp.float32)


# ----------------------------- wrappers ------------------------------------ #

def prepare_masked_linear(weight, bias=None, mask_t=None, *,
                          compute_dtype=jnp.bfloat16,
                          tile_n=None, tile_k=None):
    """One-time (cached) weight-side prep: fold mask, cast, transpose, pad.

    weight: (Out, In); bias: (Out,) or None; mask_t: (Out, In) 0/1 or None
    (weight assumed pre-masked if None).
    """
    weight = jnp.asarray(weight)
    out_features, in_features = weight.shape
    if mask_t is not None:
        # Fold the forward-path mask ONCE (exact PyTorch forward semantics).
        weight = weight * jnp.asarray(mask_t, weight.dtype)

    itemsize = jnp.dtype(compute_dtype).itemsize
    tn_auto, tk_auto = _pick_nk_tiles(out_features, in_features, itemsize,
                                      _vmem_budget_bytes())
    tn = tile_n if tile_n is not None else tn_auto
    tk = tile_k if tile_k is not None else tk_auto
    np_pad = _round_up(out_features, tn)
    kp_pad = _round_up(in_features, tk)

    # Pre-transpose to (In, Out) so the kernel is a plain (M,K)x(K,N) matmul
    # (no per-tile XLU transpose); cast once to the MXU operand dtype.
    w_t = weight.astype(compute_dtype).T
    w_p = jnp.pad(w_t, ((0, kp_pad - in_features), (0, np_pad - out_features)))

    if bias is None:
        b = jnp.zeros((out_features,), jnp.float32)
    else:
        b = jnp.asarray(bias, jnp.float32)
    b_p = jnp.pad(b, (0, np_pad - out_features)).reshape(1, np_pad)

    return dict(w=w_p, b=b_p, out_features=out_features, in_features=in_features,
                tn=tn, tk=tk, compute_dtype=compute_dtype)


def masked_linear_apply(params, x, *, tile_m=None):
    """Forward: x (B, In) -> (B, Out) f32, using cached padded params."""
    x = jnp.asarray(x)
    B, in_features = x.shape
    assert in_features == params["in_features"]
    cd = params["compute_dtype"]
    tn, tk = params["tn"], params["tk"]
    kp_pad, np_pad = params["w"].shape
    out_features = params["out_features"]

    tm = tile_m if tile_m is not None else min(_TM_MAX, _round_up(B, _SUBLANE))
    bp_pad = _round_up(B, tm)

    x_c = x.astype(cd)
    if (bp_pad, kp_pad) != (B, in_features):
        # Zero-padding: extra K columns contribute 0 to the dot product.
        x_c = jnp.pad(x_c, ((0, bp_pad - B), (0, kp_pad - in_features)))

    gm, gn, gk = bp_pad // tm, np_pad // tn, kp_pad // tk
    itemsize = jnp.dtype(cd).itemsize
    cost = pl.CostEstimate(
        flops=2 * bp_pad * kp_pad * np_pad,
        transcendentals=0,
        bytes_accessed=(gn * bp_pad * kp_pad * itemsize   # x re-streamed per N block
                        + gm * kp_pad * np_pad * itemsize # w re-streamed per M block
                        + gm * np_pad * 4                 # bias
                        + bp_pad * np_pad * 4))           # output written once

    if gk == 1:
        # K collapsed: 2-D parallel grid, single MXU sweep, no accumulator loop.
        out = pl.pallas_call(
            _masked_linear_kernel_single,
            out_shape=jax.ShapeDtypeStruct((bp_pad, np_pad), jnp.float32),
            grid_spec=pltpu.PrefetchScalarGridSpec(
                num_scalar_prefetch=0,
                grid=(gm, gn),
                in_specs=[
                    pl.BlockSpec((tm, tk), lambda i, j: (i, 0)),   # x tile
                    pl.BlockSpec((tk, tn), lambda i, j: (0, j)),   # w tile (In, Out)
                    pl.BlockSpec((1, tn), lambda i, j: (0, j)),    # bias tile
                ],
                out_specs=pl.BlockSpec((tm, tn), lambda i, j: (i, j)),
            ),
            compiler_params=pltpu.CompilerParams(
                dimension_semantics=("parallel", "parallel"),
                vmem_limit_bytes=_VMEM_LIMIT_BYTES),
            cost_estimate=cost,
        )(x_c, params["w"], params["b"])
    else:
        out = pl.pallas_call(
            _masked_linear_kernel_ksplit,
            out_shape=jax.ShapeDtypeStruct((bp_pad, np_pad), jnp.float32),
            grid_spec=pltpu.PrefetchScalarGridSpec(
                num_scalar_prefetch=0,
                grid=(gm, gn, gk),                                 # K reduction last
                in_specs=[
                    pl.BlockSpec((tm, tk), lambda i, j, k: (i, k)),   # x tile
                    pl.BlockSpec((tk, tn), lambda i, j, k: (k, j)),   # w tile
                    pl.BlockSpec((1, tn), lambda i, j, k: (0, j)),    # bias tile
                ],
                out_specs=pl.BlockSpec((tm, tn), lambda i, j, k: (i, j)),
            ),
            compiler_params=pltpu.CompilerParams(
                dimension_semantics=("parallel", "parallel", "arbitrary"),
                vmem_limit_bytes=_VMEM_LIMIT_BYTES),
            cost_estimate=cost,
        )(x_c, params["w"], params["b"])

    if (bp_pad, np_pad) != (B, out_features):
        out = out[:B, :out_features]
    return out


def masked_linear(x, weight, bias=None, mask_t=None, *, compute_dtype=jnp.bfloat16):
    """One-shot convenience wrapper (prep is NOT cached; prefer prepare+apply)."""
    params = prepare_masked_linear(weight, bias, mask_t, compute_dtype=compute_dtype)
    return masked_linear_apply(params, x)


def init_customized_linear(key, n_input, n_output):
    """Deterministic re-implementation of CustomizedLinear.__init__."""
    k_mask, k_w, k_b = jax.random.split(key, 3)
    # mask given as (n_input, n_output) of 0/1; module stores its transpose.
    mask = (jax.random.uniform(k_mask, (n_input, n_output)) > 0.5).astype(jnp.float32)
    mask_t = mask.T                                            # (out, in)

    stdv = 1.0 / math.sqrt(n_input)
    weight = jax.random.uniform(k_w, (n_output, n_input),
                                minval=-stdv, maxval=stdv).astype(jnp.float32)
    bias = jax.random.uniform(k_b, (n_output,),
                              minval=-stdv, maxval=stdv).astype(jnp.float32)
    # __init__ applies the mask to the weight data once.
    weight = weight * mask_t
    return weight, mask_t, bias


# TODO(synk): custom backward (grad_input / masked grad_weight / grad_bias) of
# CustomizedLinearFunction is not implemented; forward-pass kernel only.


if __name__ == "__main__":
    key = jax.random.PRNGKey(0)
    k1, k2, k3, kx1, kx2, kx3 = jax.random.split(key, 6)

    def _np_ref(x, w_masked, b):
        return (np.asarray(x, np.float64) @ np.asarray(w_masked, np.float64).T
                + np.asarray(b, np.float64)[None, :])

    # --- 1) module-native small shape, f32 fallback path (exact semantics) ---
    B, In, Out = 8, 32, 16
    w, m_t, b = init_customized_linear(k1, In, Out)
    x = jax.random.normal(kx1, (B, In), dtype=jnp.float32)
    p = prepare_masked_linear(w, b, m_t, compute_dtype=jnp.float32)
    o = jax.block_until_ready(masked_linear_apply(p, x))
    assert o.shape == (B, Out)
    assert np.allclose(np.asarray(o), _np_ref(x, w * m_t, b), atol=5e-3, rtol=5e-3)

    # --- 2) bf16 operands, f32 accumulation, single-sweep (K collapsed) path ---
    B, In, Out = 64, 128, 64
    w, m_t, b = init_customized_linear(k2, In, Out)
    x = jax.random.normal(kx2, (B, In), dtype=jnp.float32)
    p = prepare_masked_linear(w, b, m_t, compute_dtype=jnp.bfloat16)
    o = jax.block_until_ready(masked_linear_apply(p, x))
    x_r = np.asarray(x.astype(jnp.bfloat16).astype(jnp.float32))
    w_r = np.asarray((w * m_t).astype(jnp.bfloat16).astype(jnp.float32))
    assert o.shape == (B, Out)
    assert np.allclose(np.asarray(o), _np_ref(x_r, w_r, b), atol=5e-3, rtol=5e-3)

    # --- 3) forced multi-tile (M, N, K) grid: exercises the K-split kernel ---
    B, In, Out = 128, 256, 256
    w, m_t, b = init_customized_linear(k3, In, Out)
    x = jax.random.normal(kx3, (B, In), dtype=jnp.float32)
    p = prepare_masked_linear(w, b, m_t, compute_dtype=jnp.bfloat16,
                              tile_n=128, tile_k=128)
    o = jax.block_until_ready(masked_linear_apply(p, x, tile_m=64))   # grid (2,2,2)
    x_r = np.asarray(x.astype(jnp.bfloat16).astype(jnp.float32))
    w_r = np.asarray((w * m_t).astype(jnp.bfloat16).astype(jnp.float32))
    assert o.shape == (B, Out)
    assert np.allclose(np.asarray(o), _np_ref(x_r, w_r, b), atol=5e-3, rtol=5e-3)

    print("KERNEL_OK")
</pallas_src>

<mosaic_0001>
module attributes {stable_mosaic.version = 11 : i64} {
  func.func @_masked_linear_kernel_single(%arg0: i32, %arg1: i32, %arg2: memref<8x128xf32, #tpu.memory_space<vmem>>, %arg3: memref<128x128xf32, #tpu.memory_space<vmem>>, %arg4: memref<1x128xf32, #tpu.memory_space<vmem>>, %arg5: memref<8x128xf32, #tpu.memory_space<vmem>>) attributes {dimension_semantics = [#tpu.dimension_semantics<parallel>, #tpu.dimension_semantics<parallel>], iteration_bounds = array<i64: 1, 1>, scalar_prefetch = 0 : i64, scratch_operands = 0 : i64, tpu.core_type = #tpu.core_type<tc>, window_params = [{transform_indices = @transform_0, window_bounds = array<i64: 8, 128>}, {transform_indices = @transform_1, window_bounds = array<i64: 128, 128>}, {transform_indices = @transform_2, window_bounds = array<i64: 1, 128>}, {transform_indices = @transform_3, window_bounds = array<i64: 8, 128>}]} {
    %c0 = arith.constant 0 : index
    %c0_0 = arith.constant 0 : index
    %0 = vector.load %arg2[%c0, %c0_0] : memref<8x128xf32, #tpu.memory_space<vmem>>, vector<8x128xf32>
    %c0_1 = arith.constant 0 : index
    %c0_2 = arith.constant 0 : index
    %1 = vector.load %arg3[%c0_1, %c0_2] : memref<128x128xf32, #tpu.memory_space<vmem>>, vector<128x128xf32>
    %cst = arith.constant dense<0.000000e+00> : vector<8x128xf32>
    %2 = tpu.matmul %0, %1, %cst {dimension_numbers = #tpu.dot_dimension_numbers<[1], [0], [0], [1], [0, 0, 1, 1], [], []>} : vector<8x128xf32>, vector<128x128xf32>, vector<8x128xf32> -> vector<8x128xf32>
    %c0_3 = arith.constant 0 : index
    %c0_4 = arith.constant 0 : index
    %3 = vector.load %arg4[%c0_3, %c0_4] : memref<1x128xf32, #tpu.memory_space<vmem>>, vector<1x128xf32>
    %4 = vector.broadcast %3 : vector<1x128xf32> to vector<8x128xf32>
    %5 = arith.addf %2, %4 : vector<8x128xf32>
    %c0_5 = arith.constant 0 : index
    %c0_6 = arith.constant 0 : index
    %6 = vector.load %arg5[%c0_5, %c0_6] : memref<8x128xf32, #tpu.memory_space<vmem>>, vector<8x128xf32>
    tpu.vector_store %arg5[%c0_5, %c0_6], %5 {strides = array<i32>} : memref<8x128xf32, #tpu.memory_space<vmem>>, vector<8x128xf32>,
    return
  }
  func.func @transform_0(%arg0: i32, %arg1: i32) -> (i32, i32) {
    %c0_i32 = arith.constant 0 : i32
    %c0_i32_0 = arith.constant 0 : i32
    return %arg0, %c0_i32 : i32, i32
  }
  func.func @transform_1(%arg0: i32, %arg1: i32) -> (i32, i32) {
    %c0_i32 = arith.constant 0 : i32
    %c0_i32_0 = arith.constant 0 : i32
    return %c0_i32, %arg1 : i32, i32
  }
  func.func @transform_2(%arg0: i32, %arg1: i32) -> (i32, i32) {
    %c0_i32 = arith.constant 0 : i32
    %c0_i32_0 = arith.constant 0 : i32
    return %c0_i32, %arg1 : i32, i32
  }
  func.func @transform_3(%arg0: i32, %arg1: i32) -> (i32, i32) {
    %c0_i32 = arith.constant 0 : i32
    return %arg0, %arg1 : i32, i32
  }
}

</mosaic_0001>

<bundles_post_ra>
// kernel: tpu_custom_call.1
= control target key start
LH: loop header
LB: loop body
LE: loop exit
PB: predicated region body
PF: predicated region fallthrough
CT: control target
= control target key end

     0   :  { %8 = vsyncpa [#allocation3], 0  ;;  %s383_s0 = inlined_call_operand.hbm [shape: f32[8,128], index: 0, kind: input, shape index: {}]   ;;  %s384_s1 = inlined_call_operand.hbm [shape: f32[128,128], index: 1, kind: input, shape index: {}]   ;;  %s385_s2 = inlined_call_operand.vmem [shape: f32[1,128], index: 2, kind: input, shape index: {}]   ;;  %s386_s3 = inlined_call_operand.hbm [shape: f32[8,128], index: 3, kind: output, shape index: {}]  }
   0x1   :  { %9 = vsyncpa [#allocation6], 0 }
   0x2   :  { %10 = vsyncpa [#allocation4], 0  ;;  %s309_s12 = smov [#allocation2]   ;;  %s310_s14 = smov [#allocation5]  }
   0x3   :  { %s17_s13 = sshll.u32 %s309_s12, 4  ;;  %s26_s15 = sshll.u32 %s310_s14, 4  ;;  %s18_s13 = int_to_ptr.vmem [resolvable:$true] %s17_s13  ;;  %s337_s15 = int_to_ptr.vmem [resolvable:$true] %s26_s15 }
   0x4   :  { %s237_s18 = scalar_lea.hbm %s383_s0, 128 }
   0x5   :  { %p238_p0 = scmp.ne.s32.totalorder %s383_s0, %s237_s18  ;;  %p241_p1 = scmp.lt.u32.totalorder %s237_s18, %s383_s0 }
   0x7   :  { %p243_p2 = pnand %p241_p1, %p238_p0 }
   0x9   :  { %246 = shalt.err (!%p243_p2)
}
   0xa   :  { %s247_s23 = scalar_lea.vmem %s18_s13, 128  ;;  %p252_p4 = scmp.lt.s32.totalorder %s18_s13, %s18_s13 }
   0xb   :  { %p248_p3 = scmp.ne.s32.totalorder %s18_s13, %s247_s23  ;;  %p253_p5 = scmp.lt.s32.totalorder %s247_s23, %s247_s23 }
   0xd   :  { %p254_p6 = por %p253_p5, %p252_p4 }
   0xf   :  { %p255_p7 = pnand %p254_p6, %p248_p3 }
  0x11   :  { %258 = shalt.err (!%p255_p7)
}
  0x12   :  { %20 = dma.hbm_to_vmem [thread:$0]  %s383_s0, 128, %s18_s13, [#allocation3]  }
  0x13   :  { %s259_s28 = scalar_lea.hbm %s384_s1, 2048 }
  0x14   :  { %p260_p8 = scmp.ne.s32.totalorder %s384_s1, %s259_s28  ;;  %p263_p9 = scmp.lt.u32.totalorder %s259_s28, %s384_s1 }
  0x16   :  { %p265_p10 = pnand %p263_p9, %p260_p8 }
  0x18   :  { %268 = shalt.err (!%p265_p10)
}
  0x19   :  { %s269_s6 = scalar_lea.vmem %s337_s15, 2048  ;;  %p274_p12 = scmp.lt.s32.totalorder %s337_s15, %s337_s15 }
  0x1a   :  { %p270_p11 = scmp.ne.s32.totalorder %s337_s15, %s269_s6  ;;  %p275_p13 = scmp.lt.s32.totalorder %s269_s6, %s269_s6 }
  0x1c   :  { %p276_p0 = por %p275_p13, %p274_p12 }
  0x1e   :  { %p277_p1 = pnand %p276_p0, %p270_p11 }
  0x20   :  { %280 = shalt.err (!%p277_p1)
}
  0x21   :  { %s311_s0 = smov 128   ;;  %s312_s7 = smov 8  }
  0x22   :  { %32 = dma.hbm_to_vmem [thread:$0]  %s384_s1, 2048, %s337_s15, [#allocation6], %s311_s0, %s311_s0, %s312_s7  }
  0x23   :  { %303 = dma.done.wait [#allocation3], 128  }
  0x24   :  { %304 = vsyncadd [#allocation3], 4294967168 }
  0x25   :  { %305 = dma.done.wait [#allocation6], 2048  }
  0x26   :  { %306 = vsyncadd [#allocation6], 4294965248  ;;  %v313_v0 = vmov 0.0|0.0   ;;  %vm314_vm0 = vmmov 0   ;;  %v315_v1 = vmov 0.0   ;;  %v42_v2 = vld [vmem:[#allocation5] sm:$0xff] }
  0x27   :  { %205 = vmatprep.subr.bf16.mxu0 %v313_v0  ;;  %202 = vmatprep.mubr.msk.f32.mxu0 %vm314_vm0, %v315_v1  ;;  %v43_v3 = vld [vmem:[#allocation5 + $0x8] sm:$0xff]  ;;  %v44_v4 = vld [vmem:[#allocation5 + $0x10] sm:$0xff]  ;;  %v45_v6 = vld [vmem:[#allocation5 + $0x18] sm:$0xff]  ;;  %s316_s11 = smov [#allocation7]  }
  0x28   :  { %v206_v5 = vpack.c.bf16 %v43_v3, %v42_v2  ;;  %v209_v7 = vpack.c.bf16 %v45_v6, %v44_v4  ;;  %v46_v8 = vld [vmem:[#allocation5 + $0x20] sm:$0xff]  ;;  %v47_v9 = vld [vmem:[#allocation5 + $0x28] sm:$0xff]  ;;  %v48_v11 = vld [vmem:[#allocation5 + $0x30] sm:$0xff]  ;;  %s142_s12 = sshll.u32 %s316_s11, 4  ;;  %s143_s12 = int_to_ptr.vmem [resolvable:$true] %s142_s12 }
  0x29   :  { %v212_v10 = vpack.c.bf16 %v47_v9, %v46_v8  ;;  %v49_v12 = vld [vmem:[#allocation5 + $0x38] sm:$0xff]  ;;  %v50_v14 = vld [vmem:[#allocation5 + $0x40] sm:$0xff]  ;;  %v51_v15 = vld [vmem:[#allocation5 + $0x48] sm:$0xff]  ;;  %s281_s13 = scalar_lea.vmem %s143_s12, 128  ;;  %p286_p3 = scmp.lt.s32.totalorder %s143_s12, %s143_s12 }
  0x2a   :  { %207 = vmatpush3.bf16.msra.mxu0 %v206_v5  ;;  %v215_v13 = vpack.c.bf16 %v49_v12, %v48_v11  ;;  %v218_v16 = vpack.c.bf16 %v51_v15, %v50_v14  ;;  %v52_v17 = vld [vmem:[#allocation5 + $0x50] sm:$0xff]  ;;  %v53_v18 = vld [vmem:[#allocation5 + $0x58] sm:$0xff]  ;;  %v54_v20 = vld [vmem:[#allocation5 + $0x60] sm:$0xff]  ;;  %p282_p2 = scmp.ne.s32.totalorder %s143_s12, %s281_s13  ;;  %p287_p4 = scmp.lt.s32.totalorder %s281_s13, %s281_s13 }
  0x2b   :  { %208 = vmatprep.subr.bf16.mxu0 %v313_v0  ;;  %v221_v19 = vpack.c.bf16 %v53_v18, %v52_v17  ;;  %v55_v21 = vld [vmem:[#allocation5 + $0x68] sm:$0xff]  ;;  %v56_v23 = vld [vmem:[#allocation5 + $0x70] sm:$0xff]  ;;  %v57_v24 = vld [vmem:[#allocation5 + $0x78] sm:$0xff] }
  0x2c   :  { %v224_v22 = vpack.c.bf16 %v55_v21, %v54_v20  ;;  %v227_v25 = vpack.c.bf16 %v57_v24, %v56_v23  ;;  %v41_v26 = vld [vmem:[#allocation2] sm:$0xff]  ;;  %p288_p5 = por %p287_p4, %p286_p3 }
  0x2d   :  { %v152_v27 = vld [vmem:[%s385_s2] ss:$0 sm:$0xff] }
  0x2e   :  { %210 = vmatpush3.bf16.msra.mxu0 %v209_v7  ;;  %p289_p6 = pnand %p288_p5, %p282_p2 }
  0x2f   :  { %211 = vmatprep.subr.bf16.mxu0 %v313_v0 }
  0x32   :  { %213 = vmatpush3.bf16.msra.mxu0 %v212_v10 }
  0x33   :  { %214 = vmatprep.subr.bf16.mxu0 %v313_v0 }
  0x36   :  { %216 = vmatpush3.bf16.msra.mxu0 %v215_v13 }
  0x37   :  { %217 = vmatprep.subr.bf16.mxu0 %v313_v0 }
  0x3a   :  { %219 = vmatpush3.bf16.msra.mxu0 %v218_v16 }
  0x3b   :  { %220 = vmatprep.subr.bf16.mxu0 %v313_v0 }
  0x3e   :  { %222 = vmatpush3.bf16.msra.mxu0 %v221_v19 }
  0x3f   :  { %223 = vmatprep.subr.bf16.mxu0 %v313_v0 }
  0x42   :  { %225 = vmatpush3.bf16.msra.mxu0 %v224_v22 }
  0x43   :  { %226 = vmatprep.subr.bf16.mxu0 %v313_v0 }
  0x46   :  { %228 = vmatpush3.bf16.msra.mxu0 %v227_v25 }
  0x49   :  { %203 = vmatmul.mubr.f32.vlgmr.msra.gmra.mrb[0].mxu0 %v41_v26 }
 0x11c   :  { %v131_v28 = vpop.f32.mrb[0].mxu0 }
 0x11d   :  { %v132_v29 = vadd.f32 %v152_v27, %v131_v28  ;;  %v204_v30 = vpop.f32.mrb[1].mxu0 }
 0x11f   :  { %135 = vst [vmem:[#allocation7] sm:$0xff] %v132_v29 }
 0x120   :  { %292 = shalt.err (!%p289_p6)
}
 0x121   :  { %s293_s16 = scalar_lea.hbm %s386_s3, 128 }
 0x122   :  { %p294_p7 = scmp.ne.s32.totalorder %s386_s3, %s293_s16  ;;  %p297_p8 = scmp.lt.u32.totalorder %s293_s16, %s386_s3 }
 0x124   :  { %p299_p9 = pnand %p297_p8, %p294_p7 }
 0x126   :  { %302 = shalt.err (!%p299_p9)
}
 0x127   :  { %145 = dma.vmem_to_hbm [thread:$0]  %s143_s12, 128, %s386_s3, [#allocation4]  }
 0x128   :  { %307 = dma.done.wait [#allocation4], 128  }
 0x129   :  { %308 = vsyncadd [#allocation4], 4294967168 }
 0x12a   :  { %149 = vsyncpa [#allocation3], 1 }
 0x12b   :  { %150 = vsyncpa [#allocation6], 1 }
 0x12c   :  { %151 = vsyncpa [#allocation4], 1 }

</bundles_post_ra>
